<compile_context>
chip_gen: v7x
topology: tpu7x:2x2x1
jax: 0.10.0
libtpu: 0.0.40
codegen_flags: <defaults>
</compile_context>

<pallas_src>
import functools

import jax
import jax.numpy as jnp
from jax.experimental import pallas as pl
from jax.experimental.pallas import tpu as pltpu

_LANE = 128
_SUBLANE = 8


def _round_up(n, m):
    return ((n + m - 1) // m) * m


def ae_transformer_kernel(x_ref, w1_ref, b1_ref, w2_ref, b2_ref,
                          w3_ref, b3_ref, w4_ref, b4_ref,
                          z_ref, out_ref):
    mm_dtype = w1_ref.dtype               # bf16 (default) or f32 (exact path)
    x = x_ref[...].astype(mm_dtype)

    # --- encoder ---
    h1 = jnp.dot(x, w1_ref[...], preferred_element_type=jnp.float32)
    h1 = jnp.maximum(h1 + b1_ref[...], 0.0)          # single fused f32 bias+ReLU pass
    z = jnp.dot(h1.astype(mm_dtype), w2_ref[...],
                preferred_element_type=jnp.float32) + b2_ref[...]
    z_ref[...] = z.astype(z_ref.dtype)

    # --- decoder (uses the pre-store f32 z, same as the f32 PyTorch module) ---
    h2 = jnp.dot(z.astype(mm_dtype), w3_ref[...], preferred_element_type=jnp.float32)
    h2 = jnp.maximum(h2 + b3_ref[...], 0.0)           # single fused f32 bias+ReLU pass
    out = jnp.dot(h2.astype(mm_dtype), w4_ref[...],
                  preferred_element_type=jnp.float32) + b4_ref[...]
    out_ref[...] = out.astype(out_ref.dtype)


def prepare_params(params, weight_dtype=jnp.bfloat16):
    """Zero-pad weights/biases so every lane-facing dim is a multiple of 128.

    Weights are stored in `weight_dtype` (bf16 default: ~2-3x MXU throughput and
    half the one-time weight DMA); biases stay f32 (added post-accumulation).
    Zero padding keeps the math exact: padded x cols hit zero w1 rows, padded
    w2/b2 cols produce exactly-zero z padding, padded w3 rows multiply those
    zeros, padded w4/b4 cols are sliced off (or ignored) by the consumer.
    """
    w1, b1, w2, b2, w3, b3, w4, b4 = params
    D, H = w1.shape
    L = w2.shape[1]
    Dp = _round_up(D, _LANE)
    Lp = _round_up(L, _LANE)

    def pad2(a, rows, cols, dt):
        a = jnp.pad(a, ((0, rows - a.shape[0]), (0, cols - a.shape[1])))
        return a.astype(dt)

    padded = (
        pad2(w1, Dp, H, weight_dtype), pad2(b1, 1, H, jnp.float32),
        pad2(w2, H, Lp, weight_dtype), pad2(b2, 1, Lp, jnp.float32),
        pad2(w3, Lp, H, weight_dtype), pad2(b3, 1, H, jnp.float32),
        pad2(w4, H, Dp, weight_dtype), pad2(b4, 1, Dp, jnp.float32),
    )
    return padded, (D, L)


@functools.partial(jax.jit,
                   static_argnames=("logical_dims", "block_b", "trim_outputs"))
def ae_transformer_forward(x, padded_params, logical_dims,
                           block_b=1024, trim_outputs=True):
    """Returns (z, out) matching AETransformer.forward.

    trim_outputs=True  -> z: (B, L), out: (B, D)  (exact PyTorch shapes)
    trim_outputs=False -> padded (Bp, 128-multiple) arrays; slice at the consumer
                          to avoid an extra HBM round-trip on the outputs.
    """
    w1, b1, w2, b2, w3, b3, w4, b4 = padded_params
    D, L = logical_dims
    B = x.shape[0]
    Dp, H = w1.shape
    Lp = w2.shape[1]

    assert block_b % _SUBLANE == 0, "block_b must be a multiple of 8"

    # Batch tile: 8-row aligned, never larger than needed, and capped at
    # ceil(B/2) (rounded to 8) so the grid keeps >=2 balanced steps whenever the
    # batch allows it -> both v7x TensorCores stay busy via "parallel" semantics.
    b_pad8 = _round_up(B, _SUBLANE)
    half = max(_round_up(-(-B // 2), _SUBLANE), _SUBLANE)
    block_eff = min(block_b, b_pad8, half)
    Bp = _round_up(B, block_eff)
    grid = (Bp // block_eff,)

    # Pad batch to a tile multiple and features to 128 lanes (zeros).
    xp = x
    if Bp != B or Dp != D:
        xp = jnp.pad(x, ((0, Bp - B), (0, Dp - D)))

    # Batch tiles move along the grid; weights/biases are constant-index full
    # blocks, single-buffered (fetched once, VMEM-resident across all tiles).
    row_spec = lambda r, c: pl.BlockSpec((r, c), lambda i: (i, 0))
    const_spec = lambda shape: pl.BlockSpec(
        shape, lambda i: (0,) * len(shape), pipeline_mode=pl.Buffered(1))

    wbytes = w1.dtype.itemsize
    weight_bytes = (Dp * H + H * Lp + Lp * H + H * Dp) * wbytes
    # Double-buffered x/z/out tiles + resident weights + h1/h2 f32 temporaries.
    est_vmem = (2 * block_eff * (Dp + Lp + Dp) * 4
                + weight_bytes
                + 2 * block_eff * H * 4)
    vmem_limit = min(max(32 * 1024 * 1024, int(est_vmem * 1.5)),
                     48 * 1024 * 1024)          # stays safe on v7x's 64 MiB VMEM

    flops = 2 * Bp * (Dp * H + H * Lp + Lp * H + H * Dp)
    bytes_accessed = (4 * Bp * Dp + weight_bytes + 4 * (2 * H + Lp + Dp)
                      + 4 * Bp * Lp + 4 * Bp * Dp)

    z_pad, out_pad = pl.pallas_call(
        ae_transformer_kernel,
        out_shape=(
            jax.ShapeDtypeStruct((Bp, Lp), x.dtype),
            jax.ShapeDtypeStruct((Bp, Dp), x.dtype),
        ),
        grid_spec=pltpu.PrefetchScalarGridSpec(
            num_scalar_prefetch=0,
            grid=grid,
            in_specs=[
                row_spec(block_eff, Dp),
                const_spec((Dp, H)), const_spec((1, H)),
                const_spec((H, Lp)), const_spec((1, Lp)),
                const_spec((Lp, H)), const_spec((1, H)),
                const_spec((H, Dp)), const_spec((1, Dp)),
            ],
            out_specs=[
                row_spec(block_eff, Lp),
                row_spec(block_eff, Dp),
            ],
        ),
        compiler_params=pltpu.CompilerParams(
            dimension_semantics=("parallel",),     # shards batch tiles across TCs
            vmem_limit_bytes=vmem_limit,
        ),
        cost_estimate=pl.CostEstimate(
            flops=flops, transcendentals=0, bytes_accessed=bytes_accessed),
    )(xp, w1, b1, w2, b2, w3, b3, w4, b4)

    if not trim_outputs:
        return z_pad, out_pad

    # Slice away batch / lane padding (skipped when there is none).
    z = z_pad if (Bp == B and Lp == L) else z_pad[:B, :L]
    out = out_pad if (Bp == B and Dp == D) else out_pad[:B, :D]
    return z, out


def init_params(key, input_dim, latent_dim=32, hidden=512, dtype=jnp.float32):
    """Deterministic synthetic parameters (shapes match the nn.Linear layers)."""
    ks = jax.random.split(key, 8)

    def lin(kw, kb, fan_in, fan_out):
        bound = 1.0 / jnp.sqrt(fan_in)
        w = jax.random.uniform(kw, (fan_in, fan_out), dtype, -bound, bound)
        b = jax.random.uniform(kb, (1, fan_out), dtype, -bound, bound)
        return w, b

    w1, b1 = lin(ks[0], ks[1], input_dim, hidden)
    w2, b2 = lin(ks[2], ks[3], hidden, latent_dim)
    w3, b3 = lin(ks[4], ks[5], latent_dim, hidden)
    w4, b4 = lin(ks[6], ks[7], hidden, input_dim)
    return (w1, b1, w2, b2, w3, b3, w4, b4)


def reference_forward(x, params):
    """Plain-JAX (f32) reference of the PyTorch forward."""
    w1, b1, w2, b2, w3, b3, w4, b4 = params
    h1 = jnp.maximum(x @ w1 + b1, 0.0)
    z = h1 @ w2 + b2
    h2 = jnp.maximum(z @ w3 + b3, 0.0)
    out = h2 @ w4 + b4
    return z, out


if __name__ == "__main__":
    key = jax.random.PRNGKey(0)
    k_x, k_p, k_x2 = jax.random.split(key, 3)

    batch, input_dim, latent_dim = 8, 64, 32
    params = init_params(k_p, input_dim, latent_dim)

    # Exact-f32 padded params (for bit-faithful semantics check) and the
    # default bf16-MXU padded params (perf configuration).
    padded_f32, logical_dims = prepare_params(params, weight_dtype=jnp.float32)
    padded_bf16, _ = prepare_params(params, weight_dtype=jnp.bfloat16)

    # --- small batch, f32-exact path (single 8-row tile) ---
    x = jax.random.normal(k_x, (batch, input_dim), dtype=jnp.float32)
    z, out = ae_transformer_forward(x, padded_f32, logical_dims=logical_dims)
    jax.block_until_ready((z, out))

    z_ref, out_ref = reference_forward(x, params)
    assert z.shape == (batch, latent_dim) and out.shape == (batch, input_dim)
    assert jnp.allclose(z, z_ref, atol=1e-4, rtol=1e-4)
    assert jnp.allclose(out, out_ref, atol=1e-4, rtol=1e-4)

    # --- larger batch, default bf16-MXU path, >=2 grid steps (v7x megacore),
    #     padded outputs sliced at the consumer (trim_outputs=False). ---
    big_batch = 256
    x2 = jax.random.normal(k_x2, (big_batch, input_dim), dtype=jnp.float32)
    z2_pad, out2_pad = ae_transformer_forward(
        x2, padded_bf16, logical_dims=logical_dims, block_b=1024,
        trim_outputs=False)
    jax.block_until_ready((z2_pad, out2_pad))
    z2 = z2_pad[:big_batch, :latent_dim]
    out2 = out2_pad[:big_batch, :input_dim]

    z2_ref, out2_ref = reference_forward(x2, params)
    # bf16 MXU inputs with f32 accumulation: looser tolerance vs the f32 reference.
    assert jnp.allclose(z2, z2_ref, atol=5e-2, rtol=5e-2)
    assert jnp.allclose(out2, out2_ref, atol=5e-2, rtol=5e-2)

    # Padded lanes/rows of z must be exactly zero (padding correctness).
    assert jnp.all(z2_pad[:, latent_dim:] == 0.0)

    print("KERNEL_OK")
</pallas_src>

<mosaic_0001>
module attributes {stable_mosaic.version = 11 : i64} {
  func.func @ae_transformer_kernel(%arg0: i32, %arg1: memref<8x128xf32, #tpu.memory_space<vmem>>, %arg2: memref<128x512xf32, #tpu.memory_space<vmem>>, %arg3: memref<1x512xf32, #tpu.memory_space<vmem>>, %arg4: memref<512x128xf32, #tpu.memory_space<vmem>>, %arg5: memref<1x128xf32, #tpu.memory_space<vmem>>, %arg6: memref<128x512xf32, #tpu.memory_space<vmem>>, %arg7: memref<1x512xf32, #tpu.memory_space<vmem>>, %arg8: memref<512x128xf32, #tpu.memory_space<vmem>>, %arg9: memref<1x128xf32, #tpu.memory_space<vmem>>, %arg10: memref<8x128xf32, #tpu.memory_space<vmem>>, %arg11: memref<8x128xf32, #tpu.memory_space<vmem>>) attributes {dimension_semantics = [#tpu.dimension_semantics<parallel>], iteration_bounds = array<i64: 1>, scalar_prefetch = 0 : i64, scratch_operands = 0 : i64, tpu.core_type = #tpu.core_type<tc>, window_params = [{transform_indices = @transform_0, window_bounds = array<i64: 8, 128>}, {pipeline_mode = #tpu.pipeline_mode<synchronous>, transform_indices = @transform_1, window_bounds = array<i64: 128, 512>}, {pipeline_mode = #tpu.pipeline_mode<synchronous>, transform_indices = @transform_2, window_bounds = array<i64: 1, 512>}, {pipeline_mode = #tpu.pipeline_mode<synchronous>, transform_indices = @transform_3, window_bounds = array<i64: 512, 128>}, {pipeline_mode = #tpu.pipeline_mode<synchronous>, transform_indices = @transform_4, window_bounds = array<i64: 1, 128>}, {pipeline_mode = #tpu.pipeline_mode<synchronous>, transform_indices = @transform_5, window_bounds = array<i64: 128, 512>}, {pipeline_mode = #tpu.pipeline_mode<synchronous>, transform_indices = @transform_6, window_bounds = array<i64: 1, 512>}, {pipeline_mode = #tpu.pipeline_mode<synchronous>, transform_indices = @transform_7, window_bounds = array<i64: 512, 128>}, {pipeline_mode = #tpu.pipeline_mode<synchronous>, transform_indices = @transform_8, window_bounds = array<i64: 1, 128>}, {transform_indices = @transform_9, window_bounds = array<i64: 8, 128>}, {transform_indices = @transform_10, window_bounds = array<i64: 8, 128>}]} {
    %c0 = arith.constant 0 : index
    %c0_0 = arith.constant 0 : index
    %0 = vector.load %arg1[%c0, %c0_0] : memref<8x128xf32, #tpu.memory_space<vmem>>, vector<8x128xf32>
    %c0_1 = arith.constant 0 : index
    %c0_2 = arith.constant 0 : index
    %1 = vector.load %arg2[%c0_1, %c0_2] : memref<128x512xf32, #tpu.memory_space<vmem>>, vector<128x512xf32>
    %cst = arith.constant dense<0.000000e+00> : vector<8x512xf32>
    %2 = tpu.matmul %0, %1, %cst {dimension_numbers = #tpu.dot_dimension_numbers<[1], [0], [0], [1], [0, 0, 1, 1], [], []>} : vector<8x128xf32>, vector<128x512xf32>, vector<8x512xf32> -> vector<8x512xf32>
    %c0_3 = arith.constant 0 : index
    %c0_4 = arith.constant 0 : index
    %3 = vector.load %arg3[%c0_3, %c0_4] : memref<1x512xf32, #tpu.memory_space<vmem>>, vector<1x512xf32>
    %4 = vector.broadcast %3 : vector<1x512xf32> to vector<8x512xf32>
    %5 = arith.addf %2, %4 : vector<8x512xf32>
    %cst_5 = arith.constant 0.000000e+00 : f32
    %6 = vector.broadcast %cst_5 : f32 to vector<8x512xf32>
    %7 = arith.maximumf %5, %6 : vector<8x512xf32>
    %c0_6 = arith.constant 0 : index
    %c0_7 = arith.constant 0 : index
    %8 = vector.load %arg4[%c0_6, %c0_7] : memref<512x128xf32, #tpu.memory_space<vmem>>, vector<512x128xf32>
    %cst_8 = arith.constant dense<0.000000e+00> : vector<8x128xf32>
    %9 = tpu.matmul %7, %8, %cst_8 {dimension_numbers = #tpu.dot_dimension_numbers<[1], [0], [0], [1], [0, 0, 1, 1], [], []>} : vector<8x512xf32>, vector<512x128xf32>, vector<8x128xf32> -> vector<8x128xf32>
    %c0_9 = arith.constant 0 : index
    %c0_10 = arith.constant 0 : index
    %10 = vector.load %arg5[%c0_9, %c0_10] : memref<1x128xf32, #tpu.memory_space<vmem>>, vector<1x128xf32>
    %11 = vector.broadcast %10 : vector<1x128xf32> to vector<8x128xf32>
    %12 = arith.addf %9, %11 : vector<8x128xf32>
    %c0_11 = arith.constant 0 : index
    %c0_12 = arith.constant 0 : index
    %13 = vector.load %arg10[%c0_11, %c0_12] : memref<8x128xf32, #tpu.memory_space<vmem>>, vector<8x128xf32>
    tpu.vector_store %arg10[%c0_11, %c0_12], %12 {strides = array<i32>} : memref<8x128xf32, #tpu.memory_space<vmem>>, vector<8x128xf32>,
    %c0_13 = arith.constant 0 : index
    %c0_14 = arith.constant 0 : index
    %14 = vector.load %arg6[%c0_13, %c0_14] : memref<128x512xf32, #tpu.memory_space<vmem>>, vector<128x512xf32>
    %cst_15 = arith.constant dense<0.000000e+00> : vector<8x512xf32>
    %15 = tpu.matmul %12, %14, %cst_15 {dimension_numbers = #tpu.dot_dimension_numbers<[1], [0], [0], [1], [0, 0, 1, 1], [], []>} : vector<8x128xf32>, vector<128x512xf32>, vector<8x512xf32> -> vector<8x512xf32>
    %c0_16 = arith.constant 0 : index
    %c0_17 = arith.constant 0 : index
    %16 = vector.load %arg7[%c0_16, %c0_17] : memref<1x512xf32, #tpu.memory_space<vmem>>, vector<1x512xf32>
    %17 = vector.broadcast %16 : vector<1x512xf32> to vector<8x512xf32>
    %18 = arith.addf %15, %17 : vector<8x512xf32>
    %cst_18 = arith.constant 0.000000e+00 : f32
    %19 = vector.broadcast %cst_18 : f32 to vector<8x512xf32>
    %20 = arith.maximumf %18, %19 : vector<8x512xf32>
    %c0_19 = arith.constant 0 : index
    %c0_20 = arith.constant 0 : index
    %21 = vector.load %arg8[%c0_19, %c0_20] : memref<512x128xf32, #tpu.memory_space<vmem>>, vector<512x128xf32>
    %cst_21 = arith.constant dense<0.000000e+00> : vector<8x128xf32>
    %22 = tpu.matmul %20, %21, %cst_21 {dimension_numbers = #tpu.dot_dimension_numbers<[1], [0], [0], [1], [0, 0, 1, 1], [], []>} : vector<8x512xf32>, vector<512x128xf32>, vector<8x128xf32> -> vector<8x128xf32>
    %c0_22 = arith.constant 0 : index
    %c0_23 = arith.constant 0 : index
    %23 = vector.load %arg9[%c0_22, %c0_23] : memref<1x128xf32, #tpu.memory_space<vmem>>, vector<1x128xf32>
    %24 = vector.broadcast %23 : vector<1x128xf32> to vector<8x128xf32>
    %25 = arith.addf %22, %24 : vector<8x128xf32>
    %c0_24 = arith.constant 0 : index
    %c0_25 = arith.constant 0 : index
    %26 = vector.load %arg11[%c0_24, %c0_25] : memref<8x128xf32, #tpu.memory_space<vmem>>, vector<8x128xf32>
    tpu.vector_store %arg11[%c0_24, %c0_25], %25 {strides = array<i32>} : memref<8x128xf32, #tpu.memory_space<vmem>>, vector<8x128xf32>,
    return
  }
  func.func @transform_0(%arg0: i32) -> (i32, i32) {
    %c0_i32 = arith.constant 0 : i32
    %c0_i32_0 = arith.constant 0 : i32
    return %arg0, %c0_i32 : i32, i32
  }
  func.func @transform_1(%arg0: i32) -> (i32, i32) {
    %c0_i32 = arith.constant 0 : i32
    %c0_i32_0 = arith.constant 0 : i32
    %c0_i32_1 = arith.constant 0 : i32
    return %c0_i32, %c0_i32_0 : i32, i32
  }
  func.func @transform_2(%arg0: i32) -> (i32, i32) {
    %c0_i32 = arith.constant 0 : i32
    %c0_i32_0 = arith.constant 0 : i32
    %c0_i32_1 = arith.constant 0 : i32
    return %c0_i32, %c0_i32_0 : i32, i32
  }
  func.func @transform_3(%arg0: i32) -> (i32, i32) {
    %c0_i32 = arith.constant 0 : i32
    %c0_i32_0 = arith.constant 0 : i32
    %c0_i32_1 = arith.constant 0 : i32
    return %c0_i32, %c0_i32_0 : i32, i32
  }
  func.func @transform_4(%arg0: i32) -> (i32, i32) {
    %c0_i32 = arith.constant 0 : i32
    %c0_i32_0 = arith.constant 0 : i32
    %c0_i32_1 = arith.constant 0 : i32
    return %c0_i32, %c0_i32_0 : i32, i32
  }
  func.func @transform_5(%arg0: i32) -> (i32, i32) {
    %c0_i32 = arith.constant 0 : i32
    %c0_i32_0 = arith.constant 0 : i32
    %c0_i32_1 = arith.constant 0 : i32
    return %c0_i32, %c0_i32_0 : i32, i32
  }
  func.func @transform_6(%arg0: i32) -> (i32, i32) {
    %c0_i32 = arith.constant 0 : i32
    %c0_i32_0 = arith.constant 0 : i32
    %c0_i32_1 = arith.constant 0 : i32
    return %c0_i32, %c0_i32_0 : i32, i32
  }
  func.func @transform_7(%arg0: i32) -> (i32, i32) {
    %c0_i32 = arith.constant 0 : i32
    %c0_i32_0 = arith.constant 0 : i32
    %c0_i32_1 = arith.constant 0 : i32
    return %c0_i32, %c0_i32_0 : i32, i32
  }
  func.func @transform_8(%arg0: i32) -> (i32, i32) {
    %c0_i32 = arith.constant 0 : i32
    %c0_i32_0 = arith.constant 0 : i32
    %c0_i32_1 = arith.constant 0 : i32
    return %c0_i32, %c0_i32_0 : i32, i32
  }
  func.func @transform_9(%arg0: i32) -> (i32, i32) {
    %c0_i32 = arith.constant 0 : i32
    %c0_i32_0 = arith.constant 0 : i32
    return %arg0, %c0_i32 : i32, i32
  }
  func.func @transform_10(%arg0: i32) -> (i32, i32) {
    %c0_i32 = arith.constant 0 : i32
    %c0_i32_0 = arith.constant 0 : i32
    return %arg0, %c0_i32 : i32, i32
  }
}

</mosaic_0001>

<bundles_post_ra>
// kernel: ae_transformer_forward.1
= control target key start
LH: loop header
LB: loop body
LE: loop exit
PB: predicated region body
PF: predicated region fallthrough
CT: control target
= control target key end

     0   :  { %16 = vsyncpa [#allocation3], 0  ;;  %s1754_s0 = inlined_call_operand.vmem [shape: f32[8,128], index: 0, kind: input, shape index: {}]   ;;  %s1755_s1 = inlined_call_operand.hbm [shape: f32[128,512], index: 1, kind: input, shape index: {}]   ;;  %s1756_s2 = inlined_call_operand.vmem [shape: f32[1,512], index: 2, kind: input, shape index: {}]   ;;  %s1757_s3 = inlined_call_operand.hbm [shape: f32[512,128], index: 3, kind: input, shape index: {}]   ;;  %s1758_s4 = inlined_call_operand.vmem [shape: f32[1,128], index: 4, kind: input, shape index: {}]   ;;  %s1759_s5 = inlined_call_operand.hbm [shape: f32[128,512], index: 5, kind: input, shape index: {}]   ;;  %s1760_s6 = inlined_call_operand.vmem [shape: f32[1,512], index: 6, kind: input, shape index: {}]   ;;  %s1761_s7 = inlined_call_operand.hbm [shape: f32[512,128], index: 7, kind: input, shape index: {}]   ;;  %s1762_s8 = inlined_call_operand.vmem [shape: f32[1,128], index: 8, kind: input, shape index: {}]   ;;  %s1763_s9 = inlined_call_operand.hbm [shape: f32[8,128], index: 9, kind: output, shape index: {0}]   ;;  %s1764_s10 = inlined_call_operand.hbm [shape: f32[8,128], index: 10, kind: output, shape index: {1}]  }
   0x1   :  { %17 = vsyncpa [#allocation6], 0 }
   0x2   :  { %18 = vsyncpa [#allocation9], 0 }
   0x3   :  { %19 = vsyncpa [#allocation4], 0 }
   0x4   :  { %20 = vsyncpa [#allocation12], 0  ;;  %s1562_s13 = smov [#allocation5]   ;;  %s1420_s17 = scalar_lea.hbm %s1757_s3, 8192 }
   0x5   :  { %s42_s14 = sshll.u32 %s1562_s13, 4  ;;  %p1421_p0 = scmp.ne.s32.totalorder %s1757_s3, %s1420_s17  ;;  %s43_s14 = int_to_ptr.vmem [resolvable:$true] %s42_s14 }
   0x6   :  { %p1424_p1 = scmp.lt.u32.totalorder %s1420_s17, %s1757_s3 }
   0x8   :  { %p1426_p2 = pnand %p1424_p1, %p1421_p0 }
   0xa   :  { %1429 = shalt.err (!%p1426_p2)
}
   0xb   :  { %s1430_s22 = scalar_lea.vmem %s43_s14, 8192  ;;  %p1435_p4 = scmp.lt.s32.totalorder %s43_s14, %s43_s14 }
   0xc   :  { %p1431_p3 = scmp.ne.s32.totalorder %s43_s14, %s1430_s22  ;;  %p1436_p5 = scmp.lt.s32.totalorder %s1430_s22, %s1430_s22 }
   0xe   :  { %p1437_p6 = por %p1436_p5, %p1435_p4 }
  0x10   :  { %p1438_p7 = pnand %p1437_p6, %p1431_p3 }
  0x12   :  { %1441 = shalt.err (!%p1438_p7)
}
  0x13   :  { %s1563_s23 = smov 128   ;;  %s1564_s24 = smov 8  }
  0x14   :  { %48 = dma.hbm_to_vmem [thread:$0]  %s1757_s3, 8192, %s43_s14, [#allocation6], %s1563_s23, %s1563_s23, %s1564_s24  }
  0x15   :  { %s1565_s27 = smov [#allocation2]   ;;  %s1442_s11 = scalar_lea.hbm %s1755_s1, 8192 }
  0x16   :  { %s28_s28 = sshll.u32 %s1565_s27, 4  ;;  %p1443_p8 = scmp.ne.s32.totalorder %s1755_s1, %s1442_s11  ;;  %s29_s28 = int_to_ptr.vmem [resolvable:$true] %s28_s28 }
  0x17   :  { %p1446_p9 = scmp.lt.u32.totalorder %s1442_s11, %s1755_s1 }
  0x19   :  { %p1448_p10 = pnand %p1446_p9, %p1443_p8 }
  0x1b   :  { %1451 = shalt.err (!%p1448_p10)
}
  0x1c   :  { %s1452_s17 = scalar_lea.vmem %s29_s28, 8192  ;;  %p1457_p12 = scmp.lt.s32.totalorder %s29_s28, %s29_s28 }
  0x1d   :  { %p1453_p11 = scmp.ne.s32.totalorder %s29_s28, %s1452_s17  ;;  %p1458_p13 = scmp.lt.s32.totalorder %s1452_s17, %s1452_s17 }
  0x1f   :  { %p1459_p0 = por %p1458_p13, %p1457_p12 }
  0x21   :  { %p1460_p1 = pnand %p1459_p0, %p1453_p11 }
  0x23   :  { %1463 = shalt.err (!%p1460_p1)
}
  0x24   :  { %s1566_s3 = smov 512   ;;  %s1567_s14 = smov 32  }
  0x25   :  { %34 = dma.hbm_to_vmem [thread:$0]  %s1755_s1, 8192, %s29_s28, [#allocation3], %s1566_s3, %s1566_s3, %s1567_s14  }
  0x26   :  { %s1568_s20 = smov [#allocation7]   ;;  %s1569_s22 = smov [#allocation8]  }
  0x27   :  { %s56_s21 = sshll.u32 %s1568_s20, 4  ;;  %s70_s25 = sshll.u32 %s1569_s22, 4  ;;  %s57_s21 = int_to_ptr.vmem [resolvable:$true] %s56_s21  ;;  %s1655_s25 = int_to_ptr.vmem [resolvable:$true] %s70_s25 }
  0x28   :  { %s1464_s29 = scalar_lea.hbm %s1759_s5, 8192 }
  0x29   :  { %p1465_p2 = scmp.ne.s32.totalorder %s1759_s5, %s1464_s29  ;;  %p1468_p3 = scmp.lt.u32.totalorder %s1464_s29, %s1759_s5 }
  0x2b   :  { %p1470_p4 = pnand %p1468_p3, %p1465_p2 }
  0x2d   :  { %1473 = shalt.err (!%p1470_p4)
}
  0x2e   :  { %s1474_s1 = scalar_lea.vmem %s57_s21, 8192  ;;  %p1479_p6 = scmp.lt.s32.totalorder %s57_s21, %s57_s21 }
  0x2f   :  { %p1475_p5 = scmp.ne.s32.totalorder %s57_s21, %s1474_s1  ;;  %p1480_p7 = scmp.lt.s32.totalorder %s1474_s1, %s1474_s1 }
  0x31   :  { %p1481_p8 = por %p1480_p7, %p1479_p6 }
  0x33   :  { %p1482_p9 = pnand %p1481_p8, %p1475_p5 }
  0x35   :  { %1485 = shalt.err (!%p1482_p9)
}
  0x36   :  { %62 = dma.hbm_to_vmem [thread:$0]  %s1759_s5, 8192, %s57_s21, [#allocation6], %s1566_s3, %s1566_s3, %s1567_s14  }
  0x37   :  { %s1486_s18 = scalar_lea.hbm %s1761_s7, 8192 }
  0x38   :  { %p1487_p10 = scmp.ne.s32.totalorder %s1761_s7, %s1486_s18  ;;  %p1490_p11 = scmp.lt.u32.totalorder %s1486_s18, %s1761_s7 }
  0x3a   :  { %p1492_p12 = pnand %p1490_p11, %p1487_p10 }
  0x3c   :  { %1495 = shalt.err (!%p1492_p12)
}
  0x3d   :  { %s1496_s27 = scalar_lea.vmem %s1655_s25, 8192  ;;  %p1501_p0 = scmp.lt.s32.totalorder %s1655_s25, %s1655_s25 }
  0x3e   :  { %p1497_p13 = scmp.ne.s32.totalorder %s1655_s25, %s1496_s27  ;;  %p1502_p1 = scmp.lt.s32.totalorder %s1496_s27, %s1496_s27 }
  0x40   :  { %p1503_p2 = por %p1502_p1, %p1501_p0 }
  0x42   :  { %p1504_p3 = pnand %p1503_p2, %p1497_p13 }
  0x44   :  { %1507 = shalt.err (!%p1504_p3)
}
  0x45   :  { %76 = dma.hbm_to_vmem [thread:$0]  %s1761_s7, 8192, %s1655_s25, [#allocation9], %s1563_s23, %s1563_s23, %s1564_s24  }
  0x46   :  { %1552 = dma.done.wait [#allocation3], 8192  }
  0x47   :  { %1553 = vsyncadd [#allocation3], 4294959104 }
  0x48   :  { %1554 = dma.done.wait [#allocation6], 16384  }
  0x49   :  { %1555 = vsyncadd [#allocation6], 4294950912 }
  0x4a   :  { %1556 = dma.done.wait [#allocation9], 8192  }
  0x4b   :  { %1557 = vsyncadd [#allocation9], 4294959104  ;;  %v1570_v0 = vmov 0.0   ;;  %v93_v1 = vld [vmem:[#allocation2 + $0x8] sm:$0xff]  ;;  %v95_v3 = vld [vmem:[#allocation2 + $0x18] sm:$0xff] }
  0x4c   :  { %242 = vmatprep.mubr.f32.mxu0 %v1570_v0  ;;  %313 = vmatprep.mubr.f32.mxu1 %v1570_v0  ;;  %v97_v2 = vld [vmem:[#allocation2 + $0x28] sm:$0xff]  ;;  %v99_v5 = vld [vmem:[#allocation2 + $0x38] sm:$0xff]  ;;  %v92_v6 = vld [vmem:[#allocation2] sm:$0xff] }
  0x4d   :  { %v1153_v4 = vpack.c.bf16 %v97_v2, %v93_v1  ;;  %v96_v7 = vld [vmem:[#allocation2 + $0x20] sm:$0xff]  ;;  %v1185_v8 = vpack.c.bf16 %v99_v5, %v95_v3  ;;  %v94_v10 = vld [vmem:[#allocation2 + $0x10] sm:$0xff]  ;;  %v101_v12 = vld [vmem:[#allocation2 + $0x48] sm:$0xff] }
  0x4e   :  { %v1155_v9 = vpack.c.bf16 %v96_v7, %v92_v6  ;;  %v98_v11 = vld [vmem:[#allocation2 + $0x30] sm:$0xff]  ;;  %v105_v14 = vld [vmem:[#allocation2 + $0x68] sm:$0xff]  ;;  %v103_v15 = vld [vmem:[#allocation2 + $0x58] sm:$0xff] }
  0x4f   :  { %1154 = vmatprep.subr.bf16.mxu0 %v1153_v4  ;;  %v1187_v13 = vpack.c.bf16 %v98_v11, %v94_v10  ;;  %v107_v16 = vld [vmem:[#allocation2 + $0x78] sm:$0xff]  ;;  %1186 = vmatprep.subr.bf16.mxu1 %v1185_v8  ;;  %v1157_v17 = vpack.c.bf16 %v105_v14, %v101_v12  ;;  %v100_v19 = vld [vmem:[#allocation2 + $0x40] sm:$0xff]  ;;  %v102_v21 = vld [vmem:[#allocation2 + $0x50] sm:$0xff] }
  0x50   :  { %1156 = vmatpush1.bf16.msra.mxu0 %v1155_v9  ;;  %v1189_v18 = vpack.c.bf16 %v107_v16, %v103_v15  ;;  %v104_v20 = vld [vmem:[#allocation2 + $0x60] sm:$0xff]  ;;  %v106_v23 = vld [vmem:[#allocation2 + $0x70] sm:$0xff]  ;;  %v109_v24 = vld [vmem:[#allocation2 + $0x88] sm:$0xff] }
  0x51   :  { %1188 = vmatpush1.bf16.msra.mxu1 %v1187_v13  ;;  %v1159_v22 = vpack.c.bf16 %v104_v20, %v100_v19  ;;  %v113_v25 = vld [vmem:[#allocation2 + $0xa8] sm:$0xff]  ;;  %1158 = vmatprep.subr.bf16.mxu0 %v1157_v17  ;;  %v1191_v26 = vpack.c.bf16 %v106_v23, %v102_v21  ;;  %v111_v28 = vld [vmem:[#allocation2 + $0x98] sm:$0xff]  ;;  %v108_v30 = vld [vmem:[#allocation2 + $0x80] sm:$0xff] }
  0x52   :  { %1190 = vmatprep.subr.bf16.mxu1 %v1189_v18  ;;  %v1161_v27 = vpack.c.bf16 %v113_v25, %v109_v24  ;;  %v115_v29 = vld [vmem:[#allocation2 + $0xb8] sm:$0xff]  ;;  %v112_v32 = vld [vmem:[#allocation2 + $0xa0] sm:$0xff]  ;;  %v110_v33 = vld [vmem:[#allocation2 + $0x90] sm:$0xff] }
  0x53   :  { %v1193_v31 = vpack.c.bf16 %v115_v29, %v111_v28  ;;  %v114_v34 = vld [vmem:[#allocation2 + $0xb0] sm:$0xff]  ;;  %v1163_v35 = vpack.c.bf16 %v112_v32, %v108_v30  ;;  %v117_v36 = vld [vmem:[#allocation2 + $0xc8] sm:$0xff]  ;;  %v119_v38 = vld [vmem:[#allocation2 + $0xd8] sm:$0xff] }
  0x54   :  { %1160 = vmatpush1.bf16.msra.mxu0 %v1159_v22  ;;  %v121_v37 = vld [vmem:[#allocation2 + $0xe8] sm:$0xff]  ;;  %v1195_v39 = vpack.c.bf16 %v114_v34, %v110_v33  ;;  %v123_v41 = vld [vmem:[#allocation2 + $0xf8] sm:$0xff]  ;;  %v116_v42 = vld [vmem:[#allocation2 + $0xc0] sm:$0xff] }
  0x55   :  { %1192 = vmatpush1.bf16.msra.mxu1 %v1191_v26  ;;  %1162 = vmatprep.subr.bf16.mxu0 %v1161_v27  ;;  %v1165_v40 = vpack.c.bf16 %v121_v37, %v117_v36  ;;  %v120_v43 = vld [vmem:[#allocation2 + $0xe0] sm:$0xff]  ;;  %v1197_v44 = vpack.c.bf16 %v123_v41, %v119_v38  ;;  %v118_v45 = vld [vmem:[#allocation2 + $0xd0] sm:$0xff]  ;;  %v125_v47 = vld [vmem:[#allocation2 + $0x108] sm:$0xff] }
  0x56   :  { %1194 = vmatprep.subr.bf16.mxu1 %v1193_v31  ;;  %v122_v46 = vld [vmem:[#allocation2 + $0xf0] sm:$0xff]  ;;  %v129_v48 = vld [vmem:[#allocation2 + $0x128] sm:$0xff]  ;;  %v127_v49 = vld [vmem:[#allocation2 + $0x118] sm:$0xff]  ;;  %v1167_v51 = vpack.c.bf16 %v120_v43, %v116_v42 }
  0x57   :  { %v131_v50 = vld [vmem:[#allocation2 + $0x138] sm:$0xff]  ;;  %v1199_v52 = vpack.c.bf16 %v122_v46, %v118_v45  ;;  %v1169_v53 = vpack.c.bf16 %v129_v48, %v125_v47  ;;  %v124_v54 = vld [vmem:[#allocation2 + $0x100] sm:$0xff]  ;;  %v126_v56 = vld [vmem:[#allocation2 + $0x110] sm:$0xff] }
  0x58   :  { %1164 = vmatpush1.bf16.msra.mxu0 %v1163_v35  ;;  %v128_v55 = vld [vmem:[#allocation2 + $0x120] sm:$0xff]  ;;  %v1201_v57 = vpack.c.bf16 %v131_v50, %v127_v49  ;;  %v130_v58 = vld [vmem:[#allocation2 + $0x130] sm:$0xff]  ;;  %v133_v59 = vld [vmem:[#allocation2 + $0x148] sm:$0xff] }
  0x59   :  { %1196 = vmatpush1.bf16.msra.mxu1 %v1195_v39  ;;  %1166 = vmatprep.subr.bf16.mxu0 %v1165_v40  ;;  %v137_v60 = vld [vmem:[#allocation2 + $0x168] sm:$0xff]  ;;  %v135_v61 = vld [vmem:[#allocation2 + $0x158] sm:$0xff]  ;;  %v1171_v63 = vpack.c.bf16 %v128_v55, %v124_v54  ;;  %v1203_v1 = vpack.c.bf16 %v130_v58, %v126_v56  ;;  %v132_v3 = vld [vmem:[#allocation2 + $0x140] sm:$0xff] }
  0x5a   :  { %1198 = vmatprep.subr.bf16.mxu1 %v1197_v44  ;;  %v139_v62 = vld [vmem:[#allocation2 + $0x178] sm:$0xff]  ;;  %v1173_v2 = vpack.c.bf16 %v137_v60, %v133_v59  ;;  %v136_v4 = vld [vmem:[#allocation2 + $0x160] sm:$0xff]  ;;  %v134_v5 = vld [vmem:[#allocation2 + $0x150] sm:$0xff] }
  0x5b   :  { %v1205_v6 = vpack.c.bf16 %v139_v62, %v135_v61  ;;  %v138_v7 = vld [vmem:[#allocation2 + $0x170] sm:$0xff]  ;;  %v141_v8 = vld [vmem:[#allocation2 + $0x188] sm:$0xff]  ;;  %v143_v10 = vld [vmem:[#allocation2 + $0x198] sm:$0xff]  ;;  %v1175_v12 = vpack.c.bf16 %v136_v4, %v132_v3 }
  0x5c   :  { %1168 = vmatpush1.bf16.msra.mxu0 %v1167_v51  ;;  %v145_v9 = vld [vmem:[#allocation2 + $0x1a8] sm:$0xff]  ;;  %v147_v11 = vld [vmem:[#allocation2 + $0x1b8] sm:$0xff]  ;;  %v1207_v13 = vpack.c.bf16 %v138_v7, %v134_v5  ;;  %v140_v15 = vld [vmem:[#allocation2 + $0x180] sm:$0xff] }
  0x5d   :  { %1200 = vmatpush1.bf16.msra.mxu1 %v1199_v52  ;;  %1170 = vmatprep.subr.bf16.mxu0 %v1169_v53  ;;  %v1177_v14 = vpack.c.bf16 %v145_v9, %v141_v8  ;;  %v144_v16 = vld [vmem:[#allocation2 + $0x1a0] sm:$0xff]  ;;  %v142_v17 = vld [vmem:[#allocation2 + $0x190] sm:$0xff]  ;;  %v1209_v18 = vpack.c.bf16 %v147_v11, %v143_v10  ;;  %v149_v20 = vld [vmem:[#allocation2 + $0x1c8] sm:$0xff] }
  0x5e   :  { %1202 = vmatprep.subr.bf16.mxu1 %v1201_v57  ;;  %v146_v19 = vld [vmem:[#allocation2 + $0x1b0] sm:$0xff]  ;;  %v153_v21 = vld [vmem:[#allocation2 + $0x1e8] sm:$0xff]  ;;  %v151_v22 = vld [vmem:[#allocation2 + $0x1d8] sm:$0xff]  ;;  %v1179_v24 = vpack.c.bf16 %v144_v16, %v140_v15 }
  0x5f   :  { %v155_v23 = vld [vmem:[#allocation2 + $0x1f8] sm:$0xff]  ;;  %v1211_v25 = vpack.c.bf16 %v146_v19, %v142_v17  ;;  %v1181_v26 = vpack.c.bf16 %v153_v21, %v149_v20  ;;  %v148_v27 = vld [vmem:[#allocation2 + $0x1c0] sm:$0xff]  ;;  %v150_v29 = vld [vmem:[#allocation2 + $0x1d0] sm:$0xff] }
  0x60   :  { %1172 = vmatpush1.bf16.msra.mxu0 %v1171_v63  ;;  %v152_v28 = vld [vmem:[#allocation2 + $0x1e0] sm:$0xff]  ;;  %v1213_v30 = vpack.c.bf16 %v155_v23, %v151_v22  ;;  %v154_v31 = vld [vmem:[#allocation2 + $0x1f0] sm:$0xff]  ;;  %v341_v33 = vld [vmem:[#allocation5 + $0x88] sm:$0xff] }
  0x61   :  { %1204 = vmatpush1.bf16.msra.mxu1 %v1203_v1  ;;  %1174 = vmatprep.subr.bf16.mxu0 %v1173_v2  ;;  %v340_v32 = vld [vmem:[#allocation5 + $0x80] sm:$0xff]  ;;  %v373_v35 = vld [vmem:[#allocation5 + $0x188] sm:$0xff]  ;;  %v1183_v36 = vpack.c.bf16 %v152_v28, %v148_v27  ;;  %v1215_v37 = vpack.c.bf16 %v154_v31, %v150_v29  ;;  %v342_v44 = vld [vmem:[#allocation5 + $0x90] sm:$0xff] }
  0x62   :  { %1206 = vmatprep.subr.bf16.mxu1 %v1205_v6  ;;  %v372_v34 = vld [vmem:[#allocation5 + $0x180] sm:$0xff]  ;;  %v1217_v38 = vpack.c.bf16 %v341_v33, %v340_v32  ;;  %v325_v40 = vld [vmem:[#allocation5 + $0x8] sm:$0xff]  ;;  %v343_v45 = vld [vmem:[#allocation5 + $0x98] sm:$0xff] }
  0x63   :  { %v324_v39 = vld [vmem:[#allocation5] sm:$0xff]  ;;  %v1249_v42 = vpack.c.bf16 %v373_v35, %v372_v34  ;;  %v357_v43 = vld [vmem:[#allocation5 + $0x108] sm:$0xff]  ;;  %v374_v46 = vld [vmem:[#allocation5 + $0x190] sm:$0xff]  ;;  %v1221_v51 = vpack.c.bf16 %v343_v45, %v342_v44 }
  0x64   :  { %1176 = vmatpush1.bf16.msra.mxu0 %v1175_v12  ;;  %v356_v41 = vld [vmem:[#allocation5 + $0x100] sm:$0xff]  ;;  %v375_v47 = vld [vmem:[#allocation5 + $0x198] sm:$0xff]  ;;  %v1219_v49 = vpack.c.bf16 %v325_v40, %v324_v39  ;;  %v326_v52 = vld [vmem:[#allocation5 + $0x10] sm:$0xff] }
  0x65   :  { %1208 = vmatpush1.bf16.msra.mxu1 %v1207_v13  ;;  %1178 = vmatprep.subr.bf16.mxu0 %v1177_v14  ;;  %v91_v48 = vld [vmem:[%s1754_s0] sm:$0xff]  ;;  %v1251_v50 = vpack.c.bf16 %v357_v43, %v356_v41  ;;  %v358_v54 = vld [vmem:[#allocation5 + $0x110] sm:$0xff]  ;;  %v1253_v55 = vpack.c.bf16 %v375_v47, %v374_v46  ;;  %v344_v57 = vld [vmem:[#allocation5 + $0xa0] sm:$0xff] }
  0x66   :  { %1210 = vmatprep.subr.bf16.mxu1 %v1209_v18  ;;  %v327_v53 = vld [vmem:[#allocation5 + $0x18] sm:$0xff]  ;;  %v345_v58 = vld [vmem:[#allocation5 + $0xa8] sm:$0xff]  ;;  %v376_v59 = vld [vmem:[#allocation5 + $0x1a0] sm:$0xff] }
  0x67   :  { %v359_v56 = vld [vmem:[#allocation5 + $0x118] sm:$0xff]  ;;  %v377_v60 = vld [vmem:[#allocation5 + $0x1a8] sm:$0xff]  ;;  %v1223_v61 = vpack.c.bf16 %v327_v53, %v326_v52  ;;  %v1225_v63 = vpack.c.bf16 %v345_v58, %v344_v57  ;;  %v328_v1 = vld [vmem:[#allocation5 + $0x20] sm:$0xff] }
  0x68   :  { %1180 = vmatpush1.bf16.msra.mxu0 %v1179_v24  ;;  %v1255_v62 = vpack.c.bf16 %v359_v56, %v358_v54  ;;  %v329_v2 = vld [vmem:[#allocation5 + $0x28] sm:$0xff]  ;;  %v360_v3 = vld [vmem:[#allocation5 + $0x120] sm:$0xff]  ;;  %v1257_v4 = vpack.c.bf16 %v377_v60, %v376_v59  ;;  %v346_v6 = vld [vmem:[#allocation5 + $0xb0] sm:$0xff] }
  0x69   :  { %1212 = vmatpush1.bf16.msra.mxu1 %v1211_v25  ;;  %1182 = vmatprep.subr.bf16.mxu0 %v1181_v26  ;;  %v361_v5 = vld [vmem:[#allocation5 + $0x128] sm:$0xff]  ;;  %v347_v7 = vld [vmem:[#allocation5 + $0xb8] sm:$0xff]  ;;  %v378_v8 = vld [vmem:[#allocation5 + $0x1b0] sm:$0xff]  ;;  %v1227_v10 = vpack.c.bf16 %v329_v2, %v328_v1 }
  0x6a   :  { %1214 = vmatprep.subr.bf16.mxu1 %v1213_v30  ;;  %v379_v9 = vld [vmem:[#allocation5 + $0x1b8] sm:$0xff]  ;;  %v1259_v11 = vpack.c.bf16 %v361_v5, %v360_v3  ;;  %v1229_v12 = vpack.c.bf16 %v347_v7, %v346_v6  ;;  %v330_v13 = vld [vmem:[#allocation5 + $0x30] sm:$0xff]  ;;  %v348_v18 = vld [vmem:[#allocation5 + $0xc0] sm:$0xff] }
  0x6b   :  { %v331_v14 = vld [vmem:[#allocation5 + $0x38] sm:$0xff]  ;;  %v362_v15 = vld [vmem:[#allocation5 + $0x130] sm:$0xff]  ;;  %v1261_v16 = vpack.c.bf16 %v379_v9, %v378_v8  ;;  %v349_v19 = vld [vmem:[#allocation5 + $0xc8] sm:$0xff] }
  0x6c   :  { %1184 = vmatpush1.bf16.msra.mxu0 %v1183_v36  ;;  %v363_v17 = vld [vmem:[#allocation5 + $0x138] sm:$0xff]  ;;  %v380_v20 = vld [vmem:[#allocation5 + $0x1c0] sm:$0xff]  ;;  %v381_v21 = vld [vmem:[#allocation5 + $0x1c8] sm:$0xff]  ;;  %v1231_v22 = vpack.c.bf16 %v331_v14, %v330_v13  ;;  %v1233_v24 = vpack.c.bf16 %v349_v19, %v348_v18 }
  0x6d   :  { %1216 = vmatpush1.bf16.msra.mxu1 %v1215_v37  ;;  %1218 = vmatprep.subr.bf16.mxu0 %v1217_v38  ;;  %v1263_v23 = vpack.c.bf16 %v363_v17, %v362_v15  ;;  %v332_v25 = vld [vmem:[#allocation5 + $0x40] sm:$0xff]  ;;  %v333_v26 = vld [vmem:[#allocation5 + $0x48] sm:$0xff]  ;;  %v1265_v28 = vpack.c.bf16 %v381_v21, %v380_v20  ;;  %v350_v30 = vld [vmem:[#allocation5 + $0xd0] sm:$0xff] }
  0x6e   :  { %1250 = vmatprep.subr.bf16.mxu1 %v1249_v42  ;;  %v364_v27 = vld [vmem:[#allocation5 + $0x140] sm:$0xff]  ;;  %v365_v29 = vld [vmem:[#allocation5 + $0x148] sm:$0xff]  ;;  %v351_v31 = vld [vmem:[#allocation5 + $0xd8] sm:$0xff]  ;;  %v1235_v34 = vpack.c.bf16 %v333_v26, %v332_v25 }
  0x6f   :  { %243 = vmatmul.mubr.f32.vlgmr.msra.gmra.mrb[0].mxu0 %v91_v48  ;;  %v382_v32 = vld [vmem:[#allocation5 + $0x1d0] sm:$0xff]  ;;  %v383_v33 = vld [vmem:[#allocation5 + $0x1d8] sm:$0xff]  ;;  %v1267_v35 = vpack.c.bf16 %v365_v29, %v364_v27  ;;  %v1237_v36 = vpack.c.bf16 %v351_v31, %v350_v30  ;;  %v352_v42 = vld [vmem:[#allocation5 + $0xe0] sm:$0xff] }
  0x70   :  { %314 = vmatmul.mubr.f32.vlgmr.msra.gmra.mrb[0].mxu1 %v91_v48  ;;  %1220 = vmatpush3.bf16.msra.mxu0 %v1219_v49  ;;  %v334_v37 = vld [vmem:[#allocation5 + $0x50] sm:$0xff]  ;;  %v335_v38 = vld [vmem:[#allocation5 + $0x58] sm:$0xff]  ;;  %v1269_v40 = vpack.c.bf16 %v383_v33, %v382_v32  ;;  %v353_v43 = vld [vmem:[#allocation5 + $0xe8] sm:$0xff] }
  0x71   :  { %1252 = vmatpush3.bf16.msra.mxu1 %v1251_v50  ;;  %1222 = vmatprep.subr.bf16.mxu0 %v1221_v51  ;;  %v366_v39 = vld [vmem:[#allocation5 + $0x150] sm:$0xff]  ;;  %v367_v41 = vld [vmem:[#allocation5 + $0x158] sm:$0xff]  ;;  %v384_v44 = vld [vmem:[#allocation5 + $0x1e0] sm:$0xff]  ;;  %v1239_v46 = vpack.c.bf16 %v335_v38, %v334_v37  ;;  %v1241_v48 = vpack.c.bf16 %v353_v43, %v352_v42 }
  0x72   :  { %1254 = vmatprep.subr.bf16.mxu1 %v1253_v55  ;;  %v385_v45 = vld [vmem:[#allocation5 + $0x1e8] sm:$0xff]  ;;  %v1271_v47 = vpack.c.bf16 %v367_v41, %v366_v39  ;;  %v336_v50 = vld [vmem:[#allocation5 + $0x60] sm:$0xff]  ;;  %v354_v56 = vld [vmem:[#allocation5 + $0xf0] sm:$0xff] }
  0x73   :  { %v1273_v49 = vpack.c.bf16 %v385_v45, %v384_v44  ;;  %v337_v51 = vld [vmem:[#allocation5 + $0x68] sm:$0xff]  ;;  %v368_v52 = vld [vmem:[#allocation5 + $0x160] sm:$0xff]  ;;  %v355_v57 = vld [vmem:[#allocation5 + $0xf8] sm:$0xff] }
  0x74   :  { %1224 = vmatpush3.bf16.msra.mxu0 %v1223_v61  ;;  %v1243_v53 = vpack.c.bf16 %v337_v51, %v336_v50  ;;  %v369_v54 = vld [vmem:[#allocation5 + $0x168] sm:$0xff]  ;;  %v386_v58 = vld [vmem:[#allocation5 + $0x1f0] sm:$0xff]  ;;  %v1245_v59 = vpack.c.bf16 %v355_v57, %v354_v56  ;;  %v387_v60 = vld [vmem:[#allocation5 + $0x1f8] sm:$0xff] }
  0x75   :  { %1256 = vmatpush3.bf16.msra.mxu1 %v1255_v62  ;;  %1226 = vmatprep.subr.bf16.mxu0 %v1225_v63  ;;  %v1275_v55 = vpack.c.bf16 %v369_v54, %v368_v52  ;;  %v338_v61 = vld [vmem:[#allocation5 + $0x70] sm:$0xff]  ;;  %v339_v62 = vld [vmem:[#allocation5 + $0x78] sm:$0xff]  ;;  %v1277_v63 = vpack.c.bf16 %v387_v60, %v386_v58  ;;  %v537_v5 = vld [vmem:[#allocation7 + $0x8] sm:$0xff] }
  0x76   :  { %1258 = vmatprep.subr.bf16.mxu1 %v1257_v4  ;;  %v1247_v1 = vpack.c.bf16 %v339_v62, %v338_v61  ;;  %v370_v2 = vld [vmem:[#allocation5 + $0x170] sm:$0xff]  ;;  %v371_v3 = vld [vmem:[#allocation5 + $0x178] sm:$0xff]  ;;  %v541_v6 = vld [vmem:[#allocation7 + $0x28] sm:$0xff] }
  0x77   :  { %v1279_v4 = vpack.c.bf16 %v371_v3, %v370_v2  ;;  %v539_v7 = vld [vmem:[#allocation7 + $0x18] sm:$0xff]  ;;  %v1281_v8 = vpack.c.bf16 %v541_v6, %v537_v5  ;;  %v536_v26 = vld [vmem:[#allocation7] sm:$0xff]  ;;  %v542_v32 = vld [vmem:[#allocation7 + $0x30] sm:$0xff] }
  0x78   :  { %1228 = vmatpush3.bf16.msra.mxu0 %v1227_v10  ;;  %v543_v9 = vld [vmem:[#allocation7 + $0x38] sm:$0xff]  ;;  %v540_v27 = vld [vmem:[#allocation7 + $0x20] sm:$0xff]  ;;  %v545_v33 = vld [vmem:[#allocation7 + $0x48] sm:$0xff] }
  0x79   :  { %1260 = vmatpush3.bf16.msra.mxu1 %v1259_v11  ;;  %1230 = vmatprep.subr.bf16.mxu0 %v1229_v12  ;;  %v1313_v10 = vpack.c.bf16 %v543_v9, %v539_v7  ;;  %v158_v11 = vlaneseq  ;;  %v156_v14 = vld [vmem:[%s1756_s2] sm:$0xf]  ;;  %v544_v45 = vld [vmem:[#allocation7 + $0x40] sm:$0xff]  ;;  %v553_v50 = vld [vmem:[#allocation7 + $0x88] sm:$0xff] }
  0x7a   :  { %1262 = vmatprep.subr.bf16.mxu1 %v1261_v16  ;;  %v551_v37 = vld [vmem:[#allocation7 + $0x78] sm:$0xff]  ;;  %v557_v51 = vld [vmem:[#allocation7 + $0xa8] sm:$0xff]  ;;  %v552_v57 = vld [vmem:[#allocation7 + $0x80] sm:$0xff] }
  0x7b   :  { %v1694_v12 = vshrl.u32 %v158_v11, 7  ;;  %v555_v52 = vld [vmem:[#allocation7 + $0x98] sm:$0xff]  ;;  %v1289_v56 = vpack.c.bf16 %v557_v51, %v553_v50  ;;  %v556_v58 = vld [vmem:[#allocation7 + $0xa0] sm:$0xff]  ;;  %v558_v61 = vld [vmem:[#allocation7 + $0xb0] sm:$0xff] }
  0x7c   :  { %1232 = vmatpush3.bf16.msra.mxu0 %v1231_v22  ;;  %v561_v62 = vld [vmem:[#allocation7 + $0xc8] sm:$0xff]  ;;  %v567_v2 = vld [vmem:[#allocation7 + $0xf8] sm:$0xff]  ;;  %v1291_v3 = vpack.c.bf16 %v556_v58, %v552_v57  ;;  %v560_v6 = vld [vmem:[#allocation7 + $0xc0] sm:$0xff] }
  0x7d   :  { %1264 = vmatpush3.bf16.msra.mxu1 %v1263_v23  ;;  %1234 = vmatprep.subr.bf16.mxu0 %v1233_v24  ;;  %v160_v13 = vsub.s32 0, %v1694_v12  ;;  %v168_v15 = vsub.s32 2, %v1694_v12  ;;  %v164_v16 = vsub.s32 1, %v1694_v12  ;;  %v172_v17 = vsub.s32 3, %v1694_v12  ;;  %v564_v7 = vld [vmem:[#allocation7 + $0xe0] sm:$0xff]  ;;  %v569_v11 = vld [vmem:[#allocation7 + $0x108] sm:$0xff] }
  0x7e   :  { %1266 = vmatprep.subr.bf16.mxu1 %v1265_v28  ;;  %v538_v28 = vld [vmem:[#allocation7 + $0x10] sm:$0xff]  ;;  %v599_v57 = vld [vmem:[#allocation7 + $0x1f8] sm:$0xff]  ;;  %v592_v58 = vld [vmem:[#allocation7 + $0x1c0] sm:$0xff] }
  0x7f   :  { %v161_v18 = vrot.slane %v156_v14, %v160_v13  ;;  %v169_v19 = vrot.slane %v156_v14, %v168_v15  ;;  %v165_v20 = vrot.slane %v156_v14, %v164_v16  ;;  %v173_v21 = vrot.slane %v156_v14, %v172_v17  ;;  %v573_v14 = vld [vmem:[#allocation7 + $0x128] sm:$0xff]  ;;  %v586_v50 = vld [vmem:[#allocation7 + $0x190] sm:$0xff] }
  0x80   :  { %1236 = vmatpush3.bf16.msra.mxu0 %v1235_v34  ;;  %v549_v34 = vld [vmem:[#allocation7 + $0x68] sm:$0xff]  ;;  %v1315_v43 = vpack.c.bf16 %v542_v32, %v538_v28  ;;  %v590_v51 = vld [vmem:[#allocation7 + $0x1b0] sm:$0xff] }
  0x81   :  { %1268 = vmatpush3.bf16.msra.mxu1 %v1267_v35  ;;  %1238 = vmatprep.subr.bf16.mxu0 %v1237_v36  ;;  %v547_v36 = vld [vmem:[#allocation7 + $0x58] sm:$0xff]  ;;  %v1285_v44 = vpack.c.bf16 %v549_v34, %v545_v33  ;;  %v581_v28 = vld [vmem:[#allocation7 + $0x168] sm:$0xff]  ;;  %v576_v34 = vld [vmem:[#allocation7 + $0x140] sm:$0xff] }
  0x82   :  { %1270 = vmatprep.subr.bf16.mxu1 %v1269_v40  ;;  %v1283_v40 = vpack.c.bf16 %v540_v27, %v536_v26  ;;  %v574_v26 = vld [vmem:[#allocation7 + $0x130] sm:$0xff]  ;;  %v577_v27 = vld [vmem:[#allocation7 + $0x148] sm:$0xff] }
  0x83   :  { %v1301_v33 = vpack.c.bf16 %v581_v28, %v577_v27 }
  0x84   :  { %1240 = vmatpush3.bf16.msra.mxu0 %v1239_v46  ;;  %v548_v46 = vld [vmem:[#allocation7 + $0x60] sm:$0xff] }
  0x85   :  { %1272 = vmatpush3.bf16.msra.mxu1 %v1271_v47  ;;  %1242 = vmatprep.subr.bf16.mxu0 %v1241_v48  ;;  %v546_v47 = vld [vmem:[#allocation7 + $0x50] sm:$0xff]  ;;  %v1317_v48 = vpack.c.bf16 %v551_v37, %v547_v36  ;;  %v1287_v54 = vpack.c.bf16 %v548_v46, %v544_v45  ;;  %v591_v45 = vld [vmem:[#allocation7 + $0x1b8] sm:$0xff]  ;;  %v584_v46 = vld [vmem:[#allocation7 + $0x180] sm:$0xff] }
  0x86   :  { %1274 = vmatprep.subr.bf16.mxu1 %v1273_v49  ;;  %v550_v49 = vld [vmem:[#allocation7 + $0x70] sm:$0xff] }
  0x87   :  { %v578_v37 = vld [vmem:[#allocation7 + $0x150] sm:$0xff] }
  0x88   :  { %1244 = vmatpush3.bf16.msra.mxu0 %v1243_v53  ;;  %v559_v53 = vld [vmem:[#allocation7 + $0xb8] sm:$0xff] }
  0x89   :  { %1276 = vmatpush3.bf16.msra.mxu1 %v1275_v55  ;;  %1246 = vmatprep.subr.bf16.mxu0 %v1245_v59  ;;  %v1319_v55 = vpack.c.bf16 %v550_v49, %v546_v47  ;;  %v554_v59 = vld [vmem:[#allocation7 + $0x90] sm:$0xff]  ;;  %v1321_v60 = vpack.c.bf16 %v559_v53, %v555_v52  ;;  %v588_v47 = vld [vmem:[#allocation7 + $0x1a0] sm:$0xff]  ;;  %v1339_v52 = vpack.c.bf16 %v590_v51, %v586_v50  ;;  %v593_v53 = vld [vmem:[#allocation7 + $0x1c8] sm:$0xff] }
  0x8a   :  { %1278 = vmatprep.subr.bf16.mxu1 %v1277_v63  ;;  %v565_v63 = vld [vmem:[#allocation7 + $0xe8] sm:$0xff]  ;;  %v1307_v49 = vpack.c.bf16 %v588_v47, %v584_v46  ;;  %v804_v47 = vld [vmem:[#allocation8 + $0x120] sm:$0xff]  ;;  %v791_v50 = vld [vmem:[#allocation8 + $0xb8] sm:$0xff] }
  0x8b   :  { %v1293_v5 = vpack.c.bf16 %v565_v63, %v561_v62  ;;  %v594_v62 = vld [vmem:[#allocation7 + $0x1d0] sm:$0xff] }
  0x8c   :  { %1248 = vmatpush3.bf16.msra.mxu0 %v1247_v1  ;;  %v563_v1 = vld [vmem:[#allocation7 + $0xd8] sm:$0xff]  ;;  %v598_v63 = vld [vmem:[#allocation7 + $0x1f0] sm:$0xff] }
  0x8d   :  { %1280 = vmatpush3.bf16.msra.mxu1 %v1279_v4  ;;  %1282 = vmatprep.subr.bf16.mxu0 %v1281_v8  ;;  %v1323_v4 = vpack.c.bf16 %v558_v61, %v554_v59  ;;  %v562_v8 = vld [vmem:[#allocation7 + $0xd0] sm:$0xff]  ;;  %v1325_v9 = vpack.c.bf16 %v567_v2, %v563_v1  ;;  %v596_v59 = vld [vmem:[#allocation7 + $0x1e0] sm:$0xff]  ;;  %v1343_v1 = vpack.c.bf16 %v598_v63, %v594_v62  ;;  %v793_v62 = vld [vmem:[#allocation8 + $0xc8] sm:$0xff] }
  0x8e   :  { %1314 = vmatprep.subr.bf16.mxu1 %v1313_v10  ;;  %v566_v10 = vld [vmem:[#allocation7 + $0xf0] sm:$0xff]  ;;  %v1311_v61 = vpack.c.bf16 %v596_v59, %v592_v58  ;;  %v784_v2 = vld [vmem:[#allocation8 + $0x80] sm:$0xff] }
  0x8f   :  { %v822_v51 = vld [vmem:[#allocation8 + $0x1b0] sm:$0xff]  ;;  %v824_v63 = vld [vmem:[#allocation8 + $0x1c0] sm:$0xff] }
  0x90   :  { %v806_v59 = vld [vmem:[#allocation8 + $0x130] sm:$0xff] }
 0x142   :  { %v244_v22 = vpop.f32.mrb[0].mxu0 }
 0x143   :  { %v245_v23 = vadd.f32 %v244_v22, %v161_v18  ;;  %v315_v24 = vpop.f32.mrb[0].mxu1  ;;  %v246_v25 = vpop.f32.mrb[1].mxu0  ;;  %v571_v18 = vld [vmem:[#allocation7 + $0x118] sm:$0xff]  ;;  %v568_v22 = vld [vmem:[#allocation7 + $0x100] sm:$0xff] }
 0x144   :  { %v316_v29 = vadd.f32 %v315_v24, %v169_v19  ;;  %v247_v30 = vadd.f32 %v246_v25, %v165_v20  ;;  %v317_v31 = vpop.f32.mrb[1].mxu1  ;;  %v575_v19 = vld [vmem:[#allocation7 + $0x138] sm:$0xff]  ;;  %v1295_v20 = vpack.c.bf16 %v564_v7, %v560_v6  ;;  %v570_v24 = vld [vmem:[#allocation7 + $0x110] sm:$0xff]  ;;  %v817_v6 = vld [vmem:[#allocation8 + $0x188] sm:$0xff] }
 0x145   :  { %v318_v35 = vadd.f32 %v317_v31, %v173_v21  ;;  %v320_v41 = vmax.f32 %v245_v23, 0.0  ;;  %v1297_v21 = vpack.c.bf16 %v573_v14, %v569_v11  ;;  %v572_v23 = vld [vmem:[#allocation7 + $0x120] sm:$0xff]  ;;  %v1329_v25 = vpack.c.bf16 %v575_v19, %v571_v18  ;;  %v769_v18 = vld [vmem:[#allocation8 + $0x8] sm:$0xff] }
 0x146   :  { %v322_v38 = vmax.f32 %v316_v29, 0.0  ;;  %v321_v39 = vmax.f32 %v247_v30, 0.0  ;;  %v579_v29 = vld [vmem:[#allocation7 + $0x158] sm:$0xff]  ;;  %v1299_v31 = vpack.c.bf16 %v572_v23, %v568_v22  ;;  %v1331_v32 = vpack.c.bf16 %v574_v26, %v570_v24  ;;  %v768_v14 = vld [vmem:[#allocation8] sm:$0xff]  ;;  %v786_v22 = vld [vmem:[#allocation8 + $0x90] sm:$0xff] }
 0x147   :  { %v323_v42 = vmax.f32 %v318_v35, 0.0  ;;  %v583_v30 = vld [vmem:[#allocation7 + $0x178] sm:$0xff]  ;;  %v580_v35 = vld [vmem:[#allocation7 + $0x160] sm:$0xff]  ;;  %v1347_v28 = vpack.c.bf16 %v769_v18, %v768_v14  ;;  %v826_v14 = vld [vmem:[#allocation8 + $0x1d0] sm:$0xff] }
 0x148   :  { %459 = vmatprep.mubr.f32.mxu0 %v321_v39  ;;  %v1333_v36 = vpack.c.bf16 %v583_v30, %v579_v29  ;;  %v1303_v39 = vpack.c.bf16 %v580_v35, %v576_v34  ;;  %v787_v24 = vld [vmem:[#allocation8 + $0x98] sm:$0xff]  ;;  %v770_v30 = vld [vmem:[#allocation8 + $0x10] sm:$0xff] }
 0x149   :  { %529 = vmatprep.mubr.f32.mxu1 %v323_v42  ;;  %460 = vmatmul.mubr.f32.vlgmr.msra.gmra.mrb[2].mxu0 %v320_v41  ;;  %v585_v41 = vld [vmem:[#allocation7 + $0x188] sm:$0xff]  ;;  %v819_v26 = vld [vmem:[#allocation8 + $0x198] sm:$0xff]  ;;  %v802_v35 = vld [vmem:[#allocation8 + $0x110] sm:$0xff] }
 0x14a   :  { %530 = vmatmul.mubr.f32.vlgmr.msra.gmra.mrb[2].mxu1 %v322_v38  ;;  %1284 = vmatpush1.bf16.msra.mxu0 %v1283_v40  ;;  %v582_v38 = vld [vmem:[#allocation7 + $0x170] sm:$0xff]  ;;  %v589_v42 = vld [vmem:[#allocation7 + $0x1a8] sm:$0xff]  ;;  %v827_v18 = vld [vmem:[#allocation8 + $0x1d8] sm:$0xff] }
 0x14b   :  { %1316 = vmatpush1.bf16.msra.mxu1 %v1315_v43  ;;  %1286 = vmatprep.subr.bf16.mxu0 %v1285_v44  ;;  %v1335_v40 = vpack.c.bf16 %v582_v38, %v578_v37  ;;  %v587_v43 = vld [vmem:[#allocation7 + $0x198] sm:$0xff]  ;;  %v1305_v44 = vpack.c.bf16 %v589_v42, %v585_v41  ;;  %v788_v37 = vld [vmem:[#allocation8 + $0xa0] sm:$0xff]  ;;  %v789_v38 = vld [vmem:[#allocation8 + $0xa8] sm:$0xff] }
 0x14c   :  { %1318 = vmatprep.subr.bf16.mxu1 %v1317_v48  ;;  %686 = vmatprep.mubr.f32.mxu0 %v1570_v0  ;;  %v1337_v48 = vpack.c.bf16 %v591_v45, %v587_v43  ;;  %v772_v43 = vld [vmem:[#allocation8 + $0x20] sm:$0xff]  ;;  %v1353_v45 = vpack.c.bf16 %v789_v38, %v788_v37  ;;  %v813_v38 = vld [vmem:[#allocation8 + $0x168] sm:$0xff] }
 0x14d   :  { %757 = vmatprep.mubr.f32.mxu1 %v1570_v0  ;;  %v1327_v0 = vpack.c.bf16 %v566_v10, %v562_v8  ;;  %v1011_v10 = vld [vmem:[%s1758_s4] ss:$0 sm:$0xff] }
 0x14e   :  { %1288 = vmatpush1.bf16.msra.mxu0 %v1287_v54  ;;  %v597_v54 = vld [vmem:[#allocation7 + $0x1e8] sm:$0xff] }
 0x14f   :  { %1320 = vmatpush1.bf16.msra.mxu1 %v1319_v55  ;;  %1290 = vmatprep.subr.bf16.mxu0 %v1289_v56  ;;  %v595_v55 = vld [vmem:[#allocation7 + $0x1d8] sm:$0xff]  ;;  %v1309_v56 = vpack.c.bf16 %v597_v54, %v593_v53 }
 0x150   :  { %1322 = vmatprep.subr.bf16.mxu1 %v1321_v60  ;;  %v1341_v60 = vpack.c.bf16 %v599_v57, %v595_v55  ;;  %v774_v55 = vld [vmem:[#allocation8 + $0x30] sm:$0xff] }
 0x152   :  { %1292 = vmatpush1.bf16.msra.mxu0 %v1291_v3  ;;  %v785_v3 = vld [vmem:[#allocation8 + $0x88] sm:$0xff] }
 0x153   :  { %1324 = vmatpush1.bf16.msra.mxu1 %v1323_v4  ;;  %1294 = vmatprep.subr.bf16.mxu0 %v1293_v5  ;;  %v816_v4 = vld [vmem:[#allocation8 + $0x180] sm:$0xff]  ;;  %v1345_v5 = vpack.c.bf16 %v785_v3, %v784_v2 }
 0x154   :  { %1326 = vmatprep.subr.bf16.mxu1 %v1325_v9  ;;  %v1377_v7 = vpack.c.bf16 %v817_v6, %v816_v4  ;;  %v776_v4 = vld [vmem:[#allocation8 + $0x40] sm:$0xff] }
 0x156   :  { %1296 = vmatpush1.bf16.msra.mxu0 %v1295_v20 }
 0x157   :  { %1328 = vmatpush1.bf16.msra.mxu1 %v1327_v0  ;;  %1298 = vmatprep.subr.bf16.mxu0 %v1297_v21  ;;  %v800_v0 = vld [vmem:[#allocation8 + $0x100] sm:$0xff]  ;;  %v801_v21 = vld [vmem:[#allocation8 + $0x108] sm:$0xff] }
 0x158   :  { %1330 = vmatprep.subr.bf16.mxu1 %v1329_v25  ;;  %v818_v25 = vld [vmem:[#allocation8 + $0x190] sm:$0xff]  ;;  %v1379_v29 = vpack.c.bf16 %v801_v21, %v800_v0  ;;  %v779_v21 = vld [vmem:[#allocation8 + $0x58] sm:$0xff] }
 0x159   :  { %v1381_v34 = vpack.c.bf16 %v819_v26, %v818_v25  ;;  %v778_v0 = vld [vmem:[#allocation8 + $0x50] sm:$0xff]  ;;  %v811_v25 = vld [vmem:[#allocation8 + $0x158] sm:$0xff]  ;;  %v796_v26 = vld [vmem:[#allocation8 + $0xe0] sm:$0xff] }
 0x15a   :  { %1300 = vmatpush1.bf16.msra.mxu0 %v1299_v31  ;;  %v771_v31 = vld [vmem:[#allocation8 + $0x18] sm:$0xff] }
 0x15b   :  { %1332 = vmatpush1.bf16.msra.mxu1 %v1331_v32  ;;  %1302 = vmatprep.subr.bf16.mxu0 %v1301_v33  ;;  %v1349_v33 = vpack.c.bf16 %v787_v24, %v786_v22  ;;  %v1351_v41 = vpack.c.bf16 %v771_v31, %v770_v30  ;;  %v810_v24 = vld [vmem:[#allocation8 + $0x150] sm:$0xff]  ;;  %v1367_v30 = vpack.c.bf16 %v779_v21, %v778_v0 }
 0x15c   :  { %1334 = vmatprep.subr.bf16.mxu1 %v1333_v36  ;;  %v803_v36 = vld [vmem:[#allocation8 + $0x118] sm:$0xff]  ;;  %v1399_v31 = vpack.c.bf16 %v811_v25, %v810_v24 }
 0x15d   :  { %v1383_v42 = vpack.c.bf16 %v803_v36, %v802_v35  ;;  %v781_v35 = vld [vmem:[#allocation8 + $0x68] sm:$0xff]  ;;  %v812_v36 = vld [vmem:[#allocation8 + $0x160] sm:$0xff] }
 0x15e   :  { %1304 = vmatpush1.bf16.msra.mxu0 %v1303_v39  ;;  %v820_v39 = vld [vmem:[#allocation8 + $0x1a0] sm:$0xff] }
 0x15f   :  { %1336 = vmatpush1.bf16.msra.mxu1 %v1335_v40  ;;  %1306 = vmatprep.subr.bf16.mxu0 %v1305_v44  ;;  %v821_v40 = vld [vmem:[#allocation8 + $0x1a8] sm:$0xff] }
 0x160   :  { %1338 = vmatprep.subr.bf16.mxu1 %v1337_v48  ;;  %v773_v44 = vld [vmem:[#allocation8 + $0x28] sm:$0xff]  ;;  %v1385_v46 = vpack.c.bf16 %v821_v40, %v820_v39  ;;  %v1403_v39 = vpack.c.bf16 %v813_v38, %v812_v36  ;;  %v798_v40 = vld [vmem:[#allocation8 + $0xf0] sm:$0xff] }
 0x161   :  { %v805_v48 = vld [vmem:[#allocation8 + $0x128] sm:$0xff]  ;;  %v1355_v53 = vpack.c.bf16 %v773_v44, %v772_v43  ;;  %v831_v44 = vld [vmem:[#allocation8 + $0x1f8] sm:$0xff] }
 0x162   :  { %1308 = vmatpush1.bf16.msra.mxu0 %v1307_v49  ;;  %v790_v49 = vld [vmem:[#allocation8 + $0xb0] sm:$0xff]  ;;  %v1387_v54 = vpack.c.bf16 %v805_v48, %v804_v47 }
 0x163   :  { %1340 = vmatpush1.bf16.msra.mxu1 %v1339_v52  ;;  %1310 = vmatprep.subr.bf16.mxu0 %v1309_v56  ;;  %v823_v52 = vld [vmem:[#allocation8 + $0x1b8] sm:$0xff]  ;;  %v1357_v57 = vpack.c.bf16 %v791_v50, %v790_v49  ;;  %v814_v49 = vld [vmem:[#allocation8 + $0x170] sm:$0xff] }
 0x164   :  { %1342 = vmatprep.subr.bf16.mxu1 %v1341_v60  ;;  %v775_v56 = vld [vmem:[#allocation8 + $0x38] sm:$0xff]  ;;  %v1389_v58 = vpack.c.bf16 %v823_v52, %v822_v51 }
 0x165   :  { %v807_v60 = vld [vmem:[#allocation8 + $0x138] sm:$0xff]  ;;  %v1359_v2 = vpack.c.bf16 %v775_v56, %v774_v55 }
 0x166   :  { %1312 = vmatpush1.bf16.msra.mxu0 %v1311_v61  ;;  %v792_v61 = vld [vmem:[#allocation8 + $0xc0] sm:$0xff]  ;;  %v1391_v3 = vpack.c.bf16 %v807_v60, %v806_v59  ;;  %v815_v50 = vld [vmem:[#allocation8 + $0x178] sm:$0xff] }
 0x167   :  { %1344 = vmatpush1.bf16.msra.mxu1 %v1343_v1  ;;  %1346 = vmatprep.subr.bf16.mxu0 %v1345_v5  ;;  %v825_v1 = vld [vmem:[#allocation8 + $0x1c8] sm:$0xff]  ;;  %v1361_v6 = vpack.c.bf16 %v793_v62, %v792_v61  ;;  %v1407_v51 = vpack.c.bf16 %v815_v50, %v814_v49  ;;  %v600_v52 = vld [vmem:[%s1760_s6] sm:$0xf]  ;;  %s1571_s6 = smov [#allocation10]  }
 0x168   :  { %1378 = vmatprep.subr.bf16.mxu1 %v1377_v7  ;;  %v777_v5 = vld [vmem:[#allocation8 + $0x48] sm:$0xff]  ;;  %v1393_v7 = vpack.c.bf16 %v825_v1, %v824_v63  ;;  %v609_v55 = vrot.slane %v600_v52, %v164_v16  ;;  %v617_v56 = vrot.slane %v600_v52, %v172_v17  ;;  %s986_s25 = sshll.u32 %s1571_s6, 4  ;;  %s987_s25 = int_to_ptr.vmem [resolvable:$true] %s986_s25 }
 0x169   :  { %s1508_s29 = scalar_lea.vmem %s987_s25, 128  ;;  %p1513_p5 = scmp.lt.s32.totalorder %s987_s25, %s987_s25 }
 0x16a   :  { %p1509_p4 = scmp.ne.s32.totalorder %s987_s25, %s1508_s29  ;;  %p1514_p6 = scmp.lt.s32.totalorder %s1508_s29, %s1508_s29 }
 0x16c   :  { %p1515_p7 = por %p1514_p6, %p1513_p5 }
 0x16e   :  { %p1516_p8 = pnand %p1515_p7, %p1509_p4 }
 0x21c   :  { %v1045_v8 = vpop.f32.mrb[2].mxu0 }
 0x21d   :  { %v1080_v9 = vpop.f32.mrb[2].mxu1  ;;  %v1046_v11 = vpop.f32.mrb[3].mxu0 }
 0x21e   :  { %v1047_v19 = vadd.f32 %v1046_v11, %v1045_v8  ;;  %v1081_v20 = vpop.f32.mrb[3].mxu1  ;;  %v808_v8 = vld [vmem:[#allocation8 + $0x140] sm:$0xff]  ;;  %v795_v11 = vld [vmem:[#allocation8 + $0xd8] sm:$0xff] }
 0x21f   :  { %v1082_v23 = vadd.f32 %v1081_v20, %v1080_v9  ;;  %v809_v9 = vld [vmem:[#allocation8 + $0x148] sm:$0xff] }
 0x220   :  { %v462_v27 = vadd.f32 %v1047_v19, %v1011_v10  ;;  %v794_v10 = vld [vmem:[#allocation8 + $0xd0] sm:$0xff]  ;;  %v1363_v19 = vpack.c.bf16 %v777_v5, %v776_v4  ;;  %v1395_v20 = vpack.c.bf16 %v809_v9, %v808_v8 }
 0x221   :  { %v1365_v22 = vpack.c.bf16 %v795_v11, %v794_v10 }
 0x222   :  { %v532_v32 = vadd.f32 %v1082_v23, %v462_v27  ;;  %v1397_v23 = vpack.c.bf16 %v827_v18, %v826_v14  ;;  %v797_v27 = vld [vmem:[#allocation8 + $0xe8] sm:$0xff] }
 0x224   :  { %535 = vst [vmem:[#allocation10] sm:$0xff] %v532_v32  ;;  %687 = vmatmul.mubr.f32.vlgmr.msra.gmra.mrb[4].mxu0 %v532_v32  ;;  %758 = vmatmul.mubr.f32.vlgmr.msra.gmra.mrb[4].mxu1 %v532_v32  ;;  %v1369_v32 = vpack.c.bf16 %v797_v27, %v796_v26 }
 0x225   :  { %1348 = vmatpush3.bf16.msra.mxu0 %v1347_v28  ;;  %1380 = vmatpush3.bf16.msra.mxu1 %v1379_v29  ;;  %v828_v28 = vld [vmem:[#allocation8 + $0x1e0] sm:$0xff]  ;;  %v829_v29 = vld [vmem:[#allocation8 + $0x1e8] sm:$0xff] }
 0x226   :  { %1350 = vmatprep.subr.bf16.mxu0 %v1349_v33  ;;  %1382 = vmatprep.subr.bf16.mxu1 %v1381_v34  ;;  %v1401_v33 = vpack.c.bf16 %v829_v29, %v828_v28  ;;  %v780_v34 = vld [vmem:[#allocation8 + $0x60] sm:$0xff] }
 0x227   :  { %v1371_v37 = vpack.c.bf16 %v781_v35, %v780_v34 }
 0x229   :  { %1352 = vmatpush3.bf16.msra.mxu0 %v1351_v41  ;;  %1384 = vmatpush3.bf16.msra.mxu1 %v1383_v42  ;;  %v799_v41 = vld [vmem:[#allocation8 + $0xf8] sm:$0xff]  ;;  %v830_v42 = vld [vmem:[#allocation8 + $0x1f0] sm:$0xff] }
 0x22a   :  { %1354 = vmatprep.subr.bf16.mxu0 %v1353_v45  ;;  %1386 = vmatprep.subr.bf16.mxu1 %v1385_v46  ;;  %v1373_v43 = vpack.c.bf16 %v799_v41, %v798_v40  ;;  %v782_v45 = vld [vmem:[#allocation8 + $0x70] sm:$0xff]  ;;  %v783_v46 = vld [vmem:[#allocation8 + $0x78] sm:$0xff]  ;;  %v1405_v47 = vpack.c.bf16 %v831_v44, %v830_v42 }
 0x22b   :  { %v1375_v48 = vpack.c.bf16 %v783_v46, %v782_v45 }
 0x22d   :  { %1356 = vmatpush3.bf16.msra.mxu0 %v1355_v53  ;;  %1388 = vmatpush3.bf16.msra.mxu1 %v1387_v54  ;;  %v605_v53 = vrot.slane %v600_v52, %v160_v13  ;;  %v613_v54 = vrot.slane %v600_v52, %v168_v15 }
 0x22e   :  { %1358 = vmatprep.subr.bf16.mxu0 %v1357_v57  ;;  %1390 = vmatprep.subr.bf16.mxu1 %v1389_v58 }
 0x231   :  { %1360 = vmatpush3.bf16.msra.mxu0 %v1359_v2  ;;  %1392 = vmatpush3.bf16.msra.mxu1 %v1391_v3 }
 0x232   :  { %1362 = vmatprep.subr.bf16.mxu0 %v1361_v6  ;;  %1394 = vmatprep.subr.bf16.mxu1 %v1393_v7 }
 0x235   :  { %1364 = vmatpush3.bf16.msra.mxu0 %v1363_v19  ;;  %1396 = vmatpush3.bf16.msra.mxu1 %v1395_v20 }
 0x236   :  { %1366 = vmatprep.subr.bf16.mxu0 %v1365_v22  ;;  %1398 = vmatprep.subr.bf16.mxu1 %v1397_v23 }
 0x239   :  { %1368 = vmatpush3.bf16.msra.mxu0 %v1367_v30  ;;  %1400 = vmatpush3.bf16.msra.mxu1 %v1399_v31 }
 0x23a   :  { %1370 = vmatprep.subr.bf16.mxu0 %v1369_v32  ;;  %1402 = vmatprep.subr.bf16.mxu1 %v1401_v33 }
 0x23d   :  { %1372 = vmatpush3.bf16.msra.mxu0 %v1371_v37  ;;  %1404 = vmatpush3.bf16.msra.mxu1 %v1403_v39 }
 0x23e   :  { %1374 = vmatprep.subr.bf16.mxu0 %v1373_v43  ;;  %1406 = vmatprep.subr.bf16.mxu1 %v1405_v47 }
 0x241   :  { %1376 = vmatpush3.bf16.msra.mxu0 %v1375_v48  ;;  %1408 = vmatpush3.bf16.msra.mxu1 %v1407_v51 }
 0x2f7   :  { %v688_v57 = vpop.f32.mrb[4].mxu0  ;;  %v759_v58 = vpop.f32.mrb[4].mxu1 }
 0x2f8   :  { %v689_v59 = vadd.f32 %v688_v57, %v605_v53  ;;  %v760_v60 = vadd.f32 %v759_v58, %v613_v54  ;;  %v690_v61 = vpop.f32.mrb[5].mxu0  ;;  %v761_v62 = vpop.f32.mrb[5].mxu1 }
 0x2f9   :  { %v691_v63 = vadd.f32 %v690_v61, %v609_v55  ;;  %v762_v1 = vadd.f32 %v761_v62, %v617_v56 }
 0x2fa   :  { %v764_v13 = vmax.f32 %v689_v59, 0.0  ;;  %v766_v4 = vmax.f32 %v760_v60, 0.0 }
 0x2fb   :  { %v765_v2 = vmax.f32 %v691_v63, 0.0  ;;  %v767_v3 = vmax.f32 %v762_v1, 0.0 }
 0x2fd   :  { %903 = vmatprep.mubr.f32.mxu0 %v765_v2  ;;  %973 = vmatprep.mubr.f32.mxu1 %v767_v3 }
 0x2fe   :  { %904 = vmatmul.mubr.f32.vlgmr.msra.gmra.mrb[6].mxu0 %v764_v13  ;;  %974 = vmatmul.mubr.f32.vlgmr.msra.gmra.mrb[6].mxu1 %v766_v4 }
 0x2ff   :  { %1519 = shalt.err (!%p1516_p8)
}
 0x300   :  { %s1520_s12 = scalar_lea.hbm %s1763_s9, 128 }
 0x301   :  { %p1521_p9 = scmp.ne.s32.totalorder %s1763_s9, %s1520_s12  ;;  %p1524_p10 = scmp.lt.u32.totalorder %s1520_s12, %s1763_s9 }
 0x303   :  { %p1526_p11 = pnand %p1524_p10, %p1521_p9 }
 0x305   :  { %1529 = shalt.err (!%p1526_p11)
}
 0x306   :  { %989 = dma.vmem_to_hbm [thread:$0]  %s987_s25, 128, %s1763_s9, [#allocation4]   ;;  %v1012_v16 = vld [vmem:[%s1762_s8] ss:$0 sm:$0xff] }
 0x307   :  { %s1572_s20 = smov [#allocation11]  }
 0x308   :  { %s996_s22 = sshll.u32 %s1572_s20, 4  ;;  %s997_s22 = int_to_ptr.vmem [resolvable:$true] %s996_s22 }
 0x309   :  { %s1530_s26 = scalar_lea.vmem %s997_s22, 128  ;;  %p1535_p13 = scmp.lt.s32.totalorder %s997_s22, %s997_s22 }
 0x30a   :  { %p1531_p12 = scmp.ne.s32.totalorder %s997_s22, %s1530_s26  ;;  %p1536_p0 = scmp.lt.s32.totalorder %s1530_s26, %s1530_s26 }
 0x30c   :  { %p1537_p1 = por %p1536_p0, %p1535_p13 }
 0x30e   :  { %p1538_p2 = pnand %p1537_p1, %p1531_p12 }
 0x3d1   :  { %v1115_v12 = vpop.f32.mrb[6].mxu0  ;;  %v1150_v15 = vpop.f32.mrb[6].mxu1 }
 0x3d2   :  { %v1116_v17 = vpop.f32.mrb[7].mxu0  ;;  %v1151_v5 = vpop.f32.mrb[7].mxu1 }
 0x3d3   :  { %v1117_v6 = vadd.f32 %v1116_v17, %v1115_v12  ;;  %v1152_v7 = vadd.f32 %v1151_v5, %v1150_v15 }
 0x3d5   :  { %v906_v8 = vadd.f32 %v1117_v6, %v1012_v16 }
 0x3d7   :  { %v976_v9 = vadd.f32 %v1152_v7, %v906_v8 }
 0x3d9   :  { %979 = vst [vmem:[#allocation11] sm:$0xff] %v976_v9 }
 0x3da   :  { %1541 = shalt.err (!%p1538_p2)
}
 0x3db   :  { %s1542_s8 = scalar_lea.hbm %s1764_s10, 128 }
 0x3dc   :  { %p1543_p3 = scmp.ne.s32.totalorder %s1764_s10, %s1542_s8  ;;  %p1546_p4 = scmp.lt.u32.totalorder %s1542_s8, %s1764_s10 }
 0x3de   :  { %p1548_p5 = pnand %p1546_p4, %p1543_p3 }
 0x3e0   :  { %1551 = shalt.err (!%p1548_p5)
}
 0x3e1   :  { %999 = dma.vmem_to_hbm [thread:$0]  %s997_s22, 128, %s1764_s10, [#allocation12]  }
 0x3e2   :  { %1558 = dma.done.wait [#allocation4], 128  }
 0x3e3   :  { %1559 = vsyncadd [#allocation4], 4294967168 }
 0x3e4   :  { %1560 = dma.done.wait [#allocation12], 128  }
 0x3e5   :  { %1561 = vsyncadd [#allocation12], 4294967168 }
 0x3e6   :  { %1006 = vsyncpa [#allocation3], 1 }
 0x3e7   :  { %1007 = vsyncpa [#allocation6], 1 }
 0x3e8   :  { %1008 = vsyncpa [#allocation9], 1 }
 0x3e9   :  { %1009 = vsyncpa [#allocation4], 1 }
 0x3ea   :  { %1010 = vsyncpa [#allocation12], 1 }

</bundles_post_ra>
